<compile_context>
chip_gen: v7x
topology: tpu7x:2x2x1
jax: 0.10.0
libtpu: 0.0.40
codegen_flags: <defaults>
</compile_context>

<pallas_src>
import functools

import jax
import jax.numpy as jnp
from jax.experimental import pallas as pl
from jax.experimental.pallas import tpu as pltpu

EPS = 1e-8  # asteroid GlobLN epsilon


def _conv1d_block_kernel(x_ref, w_in_ref, pvec_ref, w_out_ref, b_out_ref,
                         alpha_ref, res_ref, skip_ref, y_pad_ref,
                         *, kernel_size, dilation, padding, in_chan, pad_lo):
    T = x_ref.shape[2]
    Chid = y_pad_ref.shape[0]
    x = x_ref[0]                                   # (Cin, T) f32
    alpha = alpha_ref[0]                           # PReLU slope (scalar, SMEM)

    pvec = pvec_ref[...]                           # (Chid, 4+K) = b_in|b_d|gamma|beta|w_d
    b_in, b_d = pvec[:, 0:1], pvec[:, 1:2]
    gamma, beta = pvec[:, 2:3], pvec[:, 3:4]
    w_d = pvec[:, 4:4 + kernel_size]               # (Chid, K)

    def prelu(v):
        return jnp.where(v >= 0.0, v, alpha * v)

    def gln(v):
        # Single-pass global LayerNorm over (C, T) with the affine folded in:
        # out = v * scale + shift, scale = gamma * rsqrt(var+eps), shift = beta - mean*scale
        n = v.shape[0] * v.shape[1]
        s1 = jnp.sum(v)
        s2 = jnp.sum(v * v)
        mean = s1 / n
        var = jnp.maximum(s2 / n - mean * mean, 0.0)
        scale = gamma * jax.lax.rsqrt(var + EPS)   # (Chid, 1)
        shift = beta - mean * scale                # (Chid, 1)
        return v * scale + shift

    # ---- 1x1 input conv (bf16 MXU, f32 accumulate) -> PReLU -> GlobLN ------
    y = jnp.dot(w_in_ref[...], x.astype(jnp.bfloat16),
                preferred_element_type=jnp.float32) + b_in
    y = gln(prelu(y))                              # (Chid, T)

    # ---- depthwise dilated conv via zero-padded VMEM scratch ----------------
    # Scratch layout: [0, pad_lo) zeros | [pad_lo, pad_lo+T) data | [.., +padding) zeros.
    # pad_lo is a multiple of 128 so the (Chid, T) data store is lane-aligned.
    # Pad regions are re-zeroed every step (megacore-safe; only a few lanes).
    if pad_lo > 0:
        y_pad_ref[:, 0:pad_lo] = jnp.zeros((Chid, pad_lo), jnp.float32)
    if padding > 0:
        y_pad_ref[:, pad_lo + T:pad_lo + T + padding] = jnp.zeros(
            (Chid, padding), jnp.float32)
    y_pad_ref[:, pad_lo:pad_lo + T] = y

    base = pad_lo - padding
    z = y_pad_ref[:, base:base + T] * w_d[:, 0:1] + b_d
    for k in range(1, kernel_size):
        off = base + k * dilation
        z = z + y_pad_ref[:, off:off + T] * w_d[:, k:k + 1]
    z = gln(prelu(z))                              # (Chid, T)

    # ---- fused 1x1 res+skip conv: one MXU matmul, then split ---------------
    out = jnp.dot(w_out_ref[...], z.astype(jnp.bfloat16),
                  preferred_element_type=jnp.float32) + b_out_ref[...]
    res_ref[0] = (x + out[:in_chan]).astype(res_ref.dtype)
    skip_ref[0] = out[in_chan:].astype(skip_ref.dtype)


def conv1d_block(x, params, *, kernel_size, dilation, padding):
    B, Cin, T = x.shape
    Chid = params["w_in"].shape[0]
    Cskip = params["w_skip"].shape[0]
    # PyTorch Conv1d output length: T + 2*padding - dilation*(K-1); require == T
    assert 2 * padding == dilation * (kernel_size - 1), "length-preserving config required"

    # Lane-aligned left offset for the depthwise pad scratch.
    pad_lo = 0 if padding == 0 else ((padding + 127) // 128) * 128
    pad_w = pad_lo + T + padding

    # Wrapper-side parameter packing / casting (done once, outside the kernel):
    w_in = params["w_in"].astype(jnp.bfloat16)                         # (Chid, Cin)
    w_out = jnp.concatenate([params["w_res"], params["w_skip"]],       # (Cin+Cskip, Chid)
                            axis=0).astype(jnp.bfloat16)
    b_out = jnp.concatenate([params["b_res"], params["b_skip"]], axis=0)   # (Cin+Cskip, 1)
    pvec = jnp.concatenate([params["b_in"], params["b_d"],
                            params["gamma"], params["beta"],
                            params["w_d"]], axis=1).astype(jnp.float32)    # (Chid, 4+K)
    alpha = params["alpha"].reshape((1,)).astype(jnp.float32)          # scalar -> SMEM

    kern = functools.partial(_conv1d_block_kernel, kernel_size=kernel_size,
                             dilation=dilation, padding=padding, in_chan=Cin,
                             pad_lo=pad_lo)

    def rep(arr):  # replicated (grid-invariant) full-array block
        nd = arr.ndim
        return pl.BlockSpec(arr.shape, lambda b, nd=nd: (0,) * nd)

    in_specs = [
        pl.BlockSpec((1, Cin, T), lambda b: (b, 0, 0)),                # x
        rep(w_in),                                                     # w_in (bf16)
        rep(pvec),                                                     # packed per-channel vecs + w_d
        rep(w_out),                                                    # fused res+skip weights
        rep(b_out),                                                    # fused res+skip bias
        pl.BlockSpec(memory_space=pltpu.MemorySpace.SMEM),             # PReLU alpha (scalar)
    ]
    out_specs = [
        pl.BlockSpec((1, Cin, T), lambda b: (b, 0, 0)),                # res_out
        pl.BlockSpec((1, Cskip, T), lambda b: (b, 0, 0)),              # skip_out
    ]
    out_shape = (
        jax.ShapeDtypeStruct((B, Cin, T), x.dtype),
        jax.ShapeDtypeStruct((B, Cskip, T), x.dtype),
    )

    # Explicit scoped-VMEM limit sized from the actual per-step footprint,
    # capped at 64 MiB (v7x per-TensorCore physical VMEM).
    f32b = 4
    est = (2 * Cin * T * f32b            # x block (double-buffered)
           + 2 * Cin * T * f32b          # res output block
           + 2 * Cskip * T * f32b        # skip output block
           + Chid * pad_w * f32b         # depthwise pad scratch
           + 8 * Chid * T * f32b)        # y/z/out working set (conservative)
    vmem_limit = int(min(64 * 1024 * 1024, max(32 * 1024 * 1024, 2 * est)))

    return pl.pallas_call(
        kern,
        out_shape=out_shape,
        grid_spec=pltpu.PrefetchScalarGridSpec(
            num_scalar_prefetch=0,
            grid=(B,),
            in_specs=in_specs,
            out_specs=out_specs,
            scratch_shapes=[pltpu.VMEM((Chid, pad_w), jnp.float32)],
        ),
        compiler_params=pltpu.CompilerParams(
            dimension_semantics=("parallel",),
            vmem_limit_bytes=vmem_limit,
        ),
    )(x, w_in, pvec, w_out, b_out, alpha)


def reference(x, params, *, kernel_size, dilation, padding):
    """Pure-JAX f32 reference (mirrors PyTorch Conv1DBlock forward)."""
    alpha = params["alpha"][0, 0]
    gamma = params["gamma"][None]
    beta = params["beta"][None]

    def prelu(v):
        return jnp.where(v >= 0, v, alpha * v)

    def gln(v):
        mean = jnp.mean(v, axis=(1, 2), keepdims=True)
        var = jnp.mean((v - mean) ** 2, axis=(1, 2), keepdims=True)
        return (v - mean) / jnp.sqrt(var + EPS) * gamma + beta

    T = x.shape[2]
    y = jnp.einsum("oc,bct->bot", params["w_in"], x) + params["b_in"][None]
    y = gln(prelu(y))
    yp = jnp.pad(y, ((0, 0), (0, 0), (padding, padding)))
    z = sum(params["w_d"][None, :, k:k + 1] * yp[:, :, k * dilation:k * dilation + T]
            for k in range(kernel_size))
    z = z + params["b_d"][None]
    z = gln(prelu(z))
    res = jnp.einsum("oc,bct->bot", params["w_res"], z) + params["b_res"][None]
    skip = jnp.einsum("oc,bct->bot", params["w_skip"], z) + params["b_skip"][None]
    return x + res, skip


def make_params(key, in_chan, hid_chan, skip_chan, kernel_size):
    ks = jax.random.split(key, 8)
    s = 0.1
    return {
        "w_in": s * jax.random.normal(ks[0], (hid_chan, in_chan), jnp.float32),
        "b_in": s * jax.random.normal(ks[1], (hid_chan, 1), jnp.float32),
        "alpha": jnp.full((1, 1), 0.25, jnp.float32),            # PReLU default init
        "gamma": 1.0 + s * jax.random.normal(ks[2], (hid_chan, 1), jnp.float32),
        "beta": s * jax.random.normal(ks[3], (hid_chan, 1), jnp.float32),
        "w_d": s * jax.random.normal(ks[4], (hid_chan, kernel_size), jnp.float32),
        "b_d": s * jax.random.normal(ks[5], (hid_chan, 1), jnp.float32),
        "w_res": s * jax.random.normal(ks[6], (in_chan, hid_chan), jnp.float32),
        "b_res": jnp.zeros((in_chan, 1), jnp.float32),
        "w_skip": s * jax.random.normal(ks[7], (skip_chan, hid_chan), jnp.float32),
        "b_skip": jnp.zeros((skip_chan, 1), jnp.float32),
    }


if __name__ == "__main__":
    B, in_chan, hid_chan, skip_chan, T = 2, 16, 32, 16, 128
    kernel_size, dilation, padding = 3, 2, 2   # length-preserving dilated depthwise conv

    key = jax.random.PRNGKey(0)
    kx, kp = jax.random.split(key)
    x = jax.random.normal(kx, (B, in_chan, T), jnp.float32)
    params = make_params(kp, in_chan, hid_chan, skip_chan, kernel_size)

    res_out, skip_out = conv1d_block(x, params, kernel_size=kernel_size,
                                     dilation=dilation, padding=padding)
    jax.block_until_ready((res_out, skip_out))

    res_ref, skip_ref = reference(x, params, kernel_size=kernel_size,
                                  dilation=dilation, padding=padding)
    assert res_out.shape == (B, in_chan, T) and skip_out.shape == (B, skip_chan, T)
    # bf16 MXU operands (f32 accumulation) => slightly looser tolerance than pure f32.
    assert jnp.allclose(res_out, res_ref, atol=3e-2, rtol=3e-2)
    assert jnp.allclose(skip_out, skip_ref, atol=3e-2, rtol=3e-2)
    print("KERNEL_OK")
</pallas_src>

<mosaic_0001>
module attributes {stable_mosaic.version = 11 : i64} {
  func.func @_conv1d_block_kernel(%arg0: i32, %arg1: memref<1x16x128xf32, #tpu.memory_space<vmem>>, %arg2: memref<32x16xbf16, #tpu.memory_space<vmem>>, %arg3: memref<32x7xf32, #tpu.memory_space<vmem>>, %arg4: memref<32x32xbf16, #tpu.memory_space<vmem>>, %arg5: memref<32x1xf32, #tpu.memory_space<vmem>>, %arg6: memref<1xf32, #tpu.memory_space<smem>>, %arg7: memref<1x16x128xf32, #tpu.memory_space<vmem>>, %arg8: memref<1x16x128xf32, #tpu.memory_space<vmem>>, %arg9: memref<32x258xf32, #tpu.memory_space<vmem>>) attributes {dimension_semantics = [#tpu.dimension_semantics<parallel>], iteration_bounds = array<i64: 2>, scalar_prefetch = 0 : i64, scratch_operands = 1 : i64, tpu.core_type = #tpu.core_type<tc>, window_params = [{transform_indices = @transform_0, window_bounds = array<i64: 1, 16, 128>}, {pipeline_mode = #tpu.pipeline_mode<synchronous>, transform_indices = @transform_1, window_bounds = array<i64: 32, 16>}, {pipeline_mode = #tpu.pipeline_mode<synchronous>, transform_indices = @transform_2, window_bounds = array<i64: 32, 7>}, {pipeline_mode = #tpu.pipeline_mode<synchronous>, transform_indices = @transform_3, window_bounds = array<i64: 32, 32>}, {pipeline_mode = #tpu.pipeline_mode<synchronous>, transform_indices = @transform_4, window_bounds = array<i64: 32, 1>}, {transform_indices = @transform_5, window_bounds = array<i64: 1>}, {transform_indices = @transform_6, window_bounds = array<i64: 1, 16, 128>}, {transform_indices = @transform_7, window_bounds = array<i64: 1, 16, 128>}]} {
    %c0 = arith.constant 0 : index
    %c0_0 = arith.constant 0 : index
    %c0_1 = arith.constant 0 : index
    %0 = vector.load %arg1[%c0, %c0_0, %c0_1] : memref<1x16x128xf32, #tpu.memory_space<vmem>>, vector<1x16x128xf32>
    %1 = vector.shape_cast %0 : vector<1x16x128xf32> to vector<16x128xf32>
    %c0_2 = arith.constant 0 : index
    %2 = memref.load %arg6[%c0_2] : memref<1xf32, #tpu.memory_space<smem>>
    %c0_3 = arith.constant 0 : index
    %c0_4 = arith.constant 0 : index
    %3 = vector.load %arg3[%c0_3, %c0_4] : memref<32x7xf32, #tpu.memory_space<vmem>>, vector<32x7xf32>
    %4 = vector.extract_strided_slice %3 {offsets = [0, 0], sizes = [32, 1], strides = [1, 1]} : vector<32x7xf32> to vector<32x1xf32>
    %5 = vector.extract_strided_slice %3 {offsets = [0, 1], sizes = [32, 1], strides = [1, 1]} : vector<32x7xf32> to vector<32x1xf32>
    %6 = vector.extract_strided_slice %3 {offsets = [0, 2], sizes = [32, 1], strides = [1, 1]} : vector<32x7xf32> to vector<32x1xf32>
    %7 = vector.extract_strided_slice %3 {offsets = [0, 3], sizes = [32, 1], strides = [1, 1]} : vector<32x7xf32> to vector<32x1xf32>
    %8 = vector.extract_strided_slice %3 {offsets = [0, 4], sizes = [32, 3], strides = [1, 1]} : vector<32x7xf32> to vector<32x3xf32>
    %c0_5 = arith.constant 0 : index
    %c0_6 = arith.constant 0 : index
    %9 = vector.load %arg2[%c0_5, %c0_6] : memref<32x16xbf16, #tpu.memory_space<vmem>>, vector<32x16xbf16>
    %10 = arith.truncf %1 : vector<16x128xf32> to vector<16x128xbf16>
    %cst = arith.constant dense<0.000000e+00> : vector<32x128xf32>
    %11 = tpu.matmul %9, %10, %cst {dimension_numbers = #tpu.dot_dimension_numbers<[1], [0], [0], [1], [0, 0, 1, 1], [], []>} : vector<32x16xbf16>, vector<16x128xbf16>, vector<32x128xf32> -> vector<32x128xf32>
    %12 = vector.broadcast %4 : vector<32x1xf32> to vector<32x128xf32>
    %13 = arith.addf %11, %12 : vector<32x128xf32>
    %cst_7 = arith.constant 0.000000e+00 : f32
    %14 = vector.broadcast %cst_7 : f32 to vector<32x128xf32>
    %15 = arith.cmpf oge, %13, %14 : vector<32x128xf32>
    %16 = vector.broadcast %2 : f32 to vector<32x128xf32>
    %17 = arith.mulf %16, %13 : vector<32x128xf32>
    %18 = arith.select %15, %13, %17 : vector<32x128xi1>, vector<32x128xf32>
    %19 = vector.shape_cast %18 : vector<32x128xf32> to vector<1x32x128xf32>
    %cst_8 = arith.constant dense<0.000000e+00> : vector<1xf32>
    %20 = vector.multi_reduction <add>, %19, %cst_8 [1, 2] : vector<1x32x128xf32> to vector<1xf32>
    %21 = vector.shape_cast %20 : vector<1xf32> to vector<1x1x1xf32>
    %22 = vector.extract %21[0, 0, 0] : f32 from vector<1x1x1xf32>
    %23 = arith.mulf %18, %18 : vector<32x128xf32>
    %24 = vector.shape_cast %23 : vector<32x128xf32> to vector<1x32x128xf32>
    %cst_9 = arith.constant dense<0.000000e+00> : vector<1xf32>
    %25 = vector.multi_reduction <add>, %24, %cst_9 [1, 2] : vector<1x32x128xf32> to vector<1xf32>
    %26 = vector.shape_cast %25 : vector<1xf32> to vector<1x1x1xf32>
    %27 = vector.extract %26[0, 0, 0] : f32 from vector<1x1x1xf32>
    %cst_10 = arith.constant 4.096000e+03 : f32
    %28 = arith.divf %22, %cst_10 : f32
    %cst_11 = arith.constant 4.096000e+03 : f32
    %29 = arith.divf %27, %cst_11 : f32
    %30 = arith.mulf %28, %28 : f32
    %31 = arith.subf %29, %30 : f32
    %cst_12 = arith.constant 0.000000e+00 : f32
    %32 = arith.maximumf %31, %cst_12 : f32
    %cst_13 = arith.constant 9.99999993E-9 : f32
    %33 = arith.addf %32, %cst_13 : f32
    %34 = math.rsqrt %33 : f32
    %35 = vector.broadcast %34 : f32 to vector<32x1xf32>
    %36 = arith.mulf %6, %35 : vector<32x1xf32>
    %37 = vector.broadcast %28 : f32 to vector<32x1xf32>
    %38 = arith.mulf %37, %36 : vector<32x1xf32>
    %39 = arith.subf %7, %38 : vector<32x1xf32>
    %40 = vector.broadcast %36 : vector<32x1xf32> to vector<32x128xf32>
    %41 = arith.mulf %18, %40 : vector<32x128xf32>
    %42 = vector.broadcast %39 : vector<32x1xf32> to vector<32x128xf32>
    %43 = arith.addf %41, %42 : vector<32x128xf32>
    %cst_14 = arith.constant 0.000000e+00 : f32
    %44 = vector.broadcast %cst_14 : f32 to vector<32x128xf32>
    %c0_15 = arith.constant 0 : index
    %c0_16 = arith.constant 0 : index
    %45 = vector.load %arg9[%c0_15, %c0_16] : memref<32x258xf32, #tpu.memory_space<vmem>>, vector<32x128xf32>
    tpu.vector_store %arg9[%c0_15, %c0_16], %44 {strides = array<i32>} : memref<32x258xf32, #tpu.memory_space<vmem>>, vector<32x128xf32>,
    %cst_17 = arith.constant 0.000000e+00 : f32
    %46 = vector.broadcast %cst_17 : f32 to vector<32x2xf32>
    %c0_18 = arith.constant 0 : index
    %c256 = arith.constant 256 : index
    %47 = vector.load %arg9[%c0_18, %c256] : memref<32x258xf32, #tpu.memory_space<vmem>>, vector<32x2xf32>
    tpu.vector_store %arg9[%c0_18, %c256], %46 {strides = array<i32>} : memref<32x258xf32, #tpu.memory_space<vmem>>, vector<32x2xf32>,
    %c0_19 = arith.constant 0 : index
    %c128 = arith.constant 128 : index
    %48 = vector.load %arg9[%c0_19, %c128] : memref<32x258xf32, #tpu.memory_space<vmem>>, vector<32x128xf32>
    tpu.vector_store %arg9[%c0_19, %c128], %43 {strides = array<i32>} : memref<32x258xf32, #tpu.memory_space<vmem>>, vector<32x128xf32>,
    %c0_20 = arith.constant 0 : index
    %c126 = arith.constant 126 : index
    %49 = vector.load %arg9[%c0_20, %c126] : memref<32x258xf32, #tpu.memory_space<vmem>>, vector<32x128xf32>
    %50 = vector.extract_strided_slice %8 {offsets = [0, 0], sizes = [32, 1], strides = [1, 1]} : vector<32x3xf32> to vector<32x1xf32>
    %51 = vector.broadcast %50 : vector<32x1xf32> to vector<32x128xf32>
    %52 = arith.mulf %49, %51 : vector<32x128xf32>
    %53 = vector.broadcast %5 : vector<32x1xf32> to vector<32x128xf32>
    %54 = arith.addf %52, %53 : vector<32x128xf32>
    %c0_21 = arith.constant 0 : index
    %c128_22 = arith.constant 128 : index
    %55 = vector.load %arg9[%c0_21, %c128_22] : memref<32x258xf32, #tpu.memory_space<vmem>>, vector<32x128xf32>
    %56 = vector.extract_strided_slice %8 {offsets = [0, 1], sizes = [32, 1], strides = [1, 1]} : vector<32x3xf32> to vector<32x1xf32>
    %57 = vector.broadcast %56 : vector<32x1xf32> to vector<32x128xf32>
    %58 = arith.mulf %55, %57 : vector<32x128xf32>
    %59 = arith.addf %54, %58 : vector<32x128xf32>
    %c0_23 = arith.constant 0 : index
    %c130 = arith.constant 130 : index
    %60 = vector.load %arg9[%c0_23, %c130] : memref<32x258xf32, #tpu.memory_space<vmem>>, vector<32x128xf32>
    %61 = vector.extract_strided_slice %8 {offsets = [0, 2], sizes = [32, 1], strides = [1, 1]} : vector<32x3xf32> to vector<32x1xf32>
    %62 = vector.broadcast %61 : vector<32x1xf32> to vector<32x128xf32>
    %63 = arith.mulf %60, %62 : vector<32x128xf32>
    %64 = arith.addf %59, %63 : vector<32x128xf32>
    %cst_24 = arith.constant 0.000000e+00 : f32
    %65 = vector.broadcast %cst_24 : f32 to vector<32x128xf32>
    %66 = arith.cmpf oge, %64, %65 : vector<32x128xf32>
    %67 = vector.broadcast %2 : f32 to vector<32x128xf32>
    %68 = arith.mulf %67, %64 : vector<32x128xf32>
    %69 = arith.select %66, %64, %68 : vector<32x128xi1>, vector<32x128xf32>
    %70 = vector.shape_cast %69 : vector<32x128xf32> to vector<1x32x128xf32>
    %cst_25 = arith.constant dense<0.000000e+00> : vector<1xf32>
    %71 = vector.multi_reduction <add>, %70, %cst_25 [1, 2] : vector<1x32x128xf32> to vector<1xf32>
    %72 = vector.shape_cast %71 : vector<1xf32> to vector<1x1x1xf32>
    %73 = vector.extract %72[0, 0, 0] : f32 from vector<1x1x1xf32>
    %74 = arith.mulf %69, %69 : vector<32x128xf32>
    %75 = vector.shape_cast %74 : vector<32x128xf32> to vector<1x32x128xf32>
    %cst_26 = arith.constant dense<0.000000e+00> : vector<1xf32>
    %76 = vector.multi_reduction <add>, %75, %cst_26 [1, 2] : vector<1x32x128xf32> to vector<1xf32>
    %77 = vector.shape_cast %76 : vector<1xf32> to vector<1x1x1xf32>
    %78 = vector.extract %77[0, 0, 0] : f32 from vector<1x1x1xf32>
    %cst_27 = arith.constant 4.096000e+03 : f32
    %79 = arith.divf %73, %cst_27 : f32
    %cst_28 = arith.constant 4.096000e+03 : f32
    %80 = arith.divf %78, %cst_28 : f32
    %81 = arith.mulf %79, %79 : f32
    %82 = arith.subf %80, %81 : f32
    %cst_29 = arith.constant 0.000000e+00 : f32
    %83 = arith.maximumf %82, %cst_29 : f32
    %cst_30 = arith.constant 9.99999993E-9 : f32
    %84 = arith.addf %83, %cst_30 : f32
    %85 = math.rsqrt %84 : f32
    %86 = vector.broadcast %85 : f32 to vector<32x1xf32>
    %87 = arith.mulf %6, %86 : vector<32x1xf32>
    %88 = vector.broadcast %79 : f32 to vector<32x1xf32>
    %89 = arith.mulf %88, %87 : vector<32x1xf32>
    %90 = arith.subf %7, %89 : vector<32x1xf32>
    %91 = vector.broadcast %87 : vector<32x1xf32> to vector<32x128xf32>
    %92 = arith.mulf %69, %91 : vector<32x128xf32>
    %93 = vector.broadcast %90 : vector<32x1xf32> to vector<32x128xf32>
    %94 = arith.addf %92, %93 : vector<32x128xf32>
    %c0_31 = arith.constant 0 : index
    %c0_32 = arith.constant 0 : index
    %95 = vector.load %arg4[%c0_31, %c0_32] : memref<32x32xbf16, #tpu.memory_space<vmem>>, vector<32x32xbf16>
    %96 = arith.truncf %94 : vector<32x128xf32> to vector<32x128xbf16>
    %cst_33 = arith.constant dense<0.000000e+00> : vector<32x128xf32>
    %97 = tpu.matmul %95, %96, %cst_33 {dimension_numbers = #tpu.dot_dimension_numbers<[1], [0], [0], [1], [0, 0, 1, 1], [], []>} : vector<32x32xbf16>, vector<32x128xbf16>, vector<32x128xf32> -> vector<32x128xf32>
    %c0_34 = arith.constant 0 : index
    %c0_35 = arith.constant 0 : index
    %98 = vector.load %arg5[%c0_34, %c0_35] : memref<32x1xf32, #tpu.memory_space<vmem>>, vector<32x1xf32>
    %99 = vector.broadcast %98 : vector<32x1xf32> to vector<32x128xf32>
    %100 = arith.addf %97, %99 : vector<32x128xf32>
    %101 = vector.extract_strided_slice %100 {offsets = [0, 0], sizes = [16, 128], strides = [1, 1]} : vector<32x128xf32> to vector<16x128xf32>
    %102 = arith.addf %1, %101 : vector<16x128xf32>
    %c0_36 = arith.constant 0 : index
    %c0_37 = arith.constant 0 : index
    %c0_38 = arith.constant 0 : index
    %103 = vector.load %arg7[%c0_36, %c0_37, %c0_38] : memref<1x16x128xf32, #tpu.memory_space<vmem>>, vector<1x16x128xf32>
    %104 = vector.shape_cast %103 : vector<1x16x128xf32> to vector<16x128xf32>
    %105 = vector.shape_cast %102 : vector<16x128xf32> to vector<1x16x128xf32>
    tpu.vector_store %arg7[%c0_36, %c0_37, %c0_38], %105 {strides = array<i32>} : memref<1x16x128xf32, #tpu.memory_space<vmem>>, vector<1x16x128xf32>,
    %106 = vector.extract_strided_slice %100 {offsets = [16, 0], sizes = [16, 128], strides = [1, 1]} : vector<32x128xf32> to vector<16x128xf32>
    %c0_39 = arith.constant 0 : index
    %c0_40 = arith.constant 0 : index
    %c0_41 = arith.constant 0 : index
    %107 = vector.load %arg8[%c0_39, %c0_40, %c0_41] : memref<1x16x128xf32, #tpu.memory_space<vmem>>, vector<1x16x128xf32>
    %108 = vector.shape_cast %107 : vector<1x16x128xf32> to vector<16x128xf32>
    %109 = vector.shape_cast %106 : vector<16x128xf32> to vector<1x16x128xf32>
    tpu.vector_store %arg8[%c0_39, %c0_40, %c0_41], %109 {strides = array<i32>} : memref<1x16x128xf32, #tpu.memory_space<vmem>>, vector<1x16x128xf32>,
    return
  }
  func.func @transform_0(%arg0: i32) -> (i32, i32, i32) {
    %c0_i32 = arith.constant 0 : i32
    %c0_i32_0 = arith.constant 0 : i32
    %c0_i32_1 = arith.constant 0 : i32
    return %arg0, %c0_i32, %c0_i32_0 : i32, i32, i32
  }
  func.func @transform_1(%arg0: i32) -> (i32, i32) {
    %c0_i32 = arith.constant 0 : i32
    %c0_i32_0 = arith.constant 0 : i32
    %c0_i32_1 = arith.constant 0 : i32
    return %c0_i32, %c0_i32_0 : i32, i32
  }
  func.func @transform_2(%arg0: i32) -> (i32, i32) {
    %c0_i32 = arith.constant 0 : i32
    %c0_i32_0 = arith.constant 0 : i32
    %c0_i32_1 = arith.constant 0 : i32
    return %c0_i32, %c0_i32_0 : i32, i32
  }
  func.func @transform_3(%arg0: i32) -> (i32, i32) {
    %c0_i32 = arith.constant 0 : i32
    %c0_i32_0 = arith.constant 0 : i32
    %c0_i32_1 = arith.constant 0 : i32
    return %c0_i32, %c0_i32_0 : i32, i32
  }
  func.func @transform_4(%arg0: i32) -> (i32, i32) {
    %c0_i32 = arith.constant 0 : i32
    %c0_i32_0 = arith.constant 0 : i32
    %c0_i32_1 = arith.constant 0 : i32
    return %c0_i32, %c0_i32_0 : i32, i32
  }
  func.func @transform_5(%arg0: i32) -> i32 {
    %c0_i32 = arith.constant 0 : i32
    %c0_i32_0 = arith.constant 0 : i32
    return %c0_i32 : i32
  }
  func.func @transform_6(%arg0: i32) -> (i32, i32, i32) {
    %c0_i32 = arith.constant 0 : i32
    %c0_i32_0 = arith.constant 0 : i32
    %c0_i32_1 = arith.constant 0 : i32
    return %arg0, %c0_i32, %c0_i32_0 : i32, i32, i32
  }
  func.func @transform_7(%arg0: i32) -> (i32, i32, i32) {
    %c0_i32 = arith.constant 0 : i32
    %c0_i32_0 = arith.constant 0 : i32
    %c0_i32_1 = arith.constant 0 : i32
    return %arg0, %c0_i32, %c0_i32_0 : i32, i32, i32
  }
}

</mosaic_0001>

<bundles_post_ra>
// kernel: tpu_custom_call.1
= control target key start
LH: loop header
LB: loop body
LE: loop exit
PB: predicated region body
PF: predicated region fallthrough
CT: control target
= control target key end

     0   :  { %s1885_s0 = inlined_call_operand.vmem [shape: f32[2,16,128], index: 0, kind: input, shape index: {}]   ;;  %s1886_s1 = inlined_call_operand.vmem [shape: bf16[32,16], index: 1, kind: input, shape index: {}]   ;;  %s1887_s2 = inlined_call_operand.vmem [shape: f32[32,7], index: 2, kind: input, shape index: {}]   ;;  %s1888_s3 = inlined_call_operand.vmem [shape: bf16[32,32], index: 3, kind: input, shape index: {}]   ;;  %s1889_s4 = inlined_call_operand.vmem [shape: f32[32,1], index: 4, kind: input, shape index: {}]   ;;  %s1890_s5 = inlined_call_operand.<no memory space> [shape: f32[1], index: 5, kind: input, shape index: {}]   ;;  %s1891_s6 = inlined_call_operand.hbm [shape: f32[2,16,128], index: 6, kind: output, shape index: {0}]   ;;  %s1892_s7 = inlined_call_operand.hbm [shape: f32[2,16,128], index: 7, kind: output, shape index: {1}]  }
   0x1   :  { %13 = sst [smem:[#allocation3]] %s1890_s5 }
   0x2   :  { %14 = vsyncpa [#allocation5], 0 }
   0x3   :  { %16 = vsyncpa [#allocation5 + $0x1], 0 }
   0x4   :  { %17 = vsyncpa [#allocation7], 0 }
   0x5   :  { %19 = vsyncpa [#allocation7 + $0x1], 0  ;;  %s1486_s26 = smov 0   ;;  %s1488_s27 = smov 0  }
   0x6   :  { %s1490_s28 = smov 0   ;;  %s1492_s29 = smov 0  }
   0x7 LB: > { %s1507_s5 = sadd.s32 4294967295, %s1424_s29   ;;  %s1179_s30 = sadd.s32 4294967294, %s1424_s29   ;;  %s1424_s29 = sphi %s1492_s29, %s1898_s29   ;;  %s1420_s28 = sphi %s1490_s28, %s1897_s28   ;;  %s1416_s27 = sphi %s1488_s27, %s1896_s27   ;;  %s1412_s26 = sphi %s1486_s26, %s1895_s26  }
   0x8   : > { %s1511_s8 = sadd.s32 1, %s1424_s29   ;;  %s163_s9 = sadd.s32 1, %s1420_s28 }
   0x9   : > { %s160_s10 = ssub.s32 %s1424_s29, %s1511_s8  ;;  %p173_p0 = scmp.ne.s32.totalorder %s1420_s28, %s1416_s27 }
   0xa   : > { %p161_p1 = scmp.eq.s32.totalorder %s160_s10, 0  ;;  %p174_p2 = scmp.eq.s32.totalorder %s1507_s5, 1 }
   0xb   : > { %p179_p3 = scmp.ne.s32.totalorder %s1416_s27, %s1412_s26  ;;  %p180_p4 = scmp.eq.s32.totalorder %s1179_s30, 1 }
   0xc   : > { %s1522_s11 = scalar_select %p161_p1, %s1420_s28, %s163_s9  }
   0xd   : > { %p1524_p5 = por %p174_p2, %p173_p0  ;;  %p1528_p6 = por %p180_p4, %p179_p3 }
   0xe   : > { %p1182_p7 = scmp.ge.s32.totalorder %s1424_s29, 1  ;;  %p247_p8 = scmp.lt.s32.totalorder %s1424_s29, 3 }
  0x10   : > { %p248_p9 = pnand %p1182_p7, %p247_p8 }
  0x11   : > { %p284_p10 = scmp.lt.s32.totalorder (!%p248_p9), %s1507_s5, 1  ;;  %v1322_v0 = vld [vmem:[%s1886_s1] sm:$0xff] (!%p248_p9)   ;;  %vm332_vm0 = vcmask (!%p248_p9), 130048   ;;  %v1548_v2 = vld [vmem:[%s1887_s2 + $0x10] sm:$0xff] (!%p248_p9)  ;;  %v1426_v3 = vmov (!%p248_p9), 0   ;;  %v1560_v4 = vld [vmem:[%s1887_s2 + $0x8] sm:$0xff] (!%p248_p9) }
  0x12   : > { %251 = sbr.rel (%p248_p9) target bundleno = 1991 (0x7c7), region = 44  ;;  %1215 = vmatprep.mubr.msk.bf16.mxu0 (!%p248_p9), %vm332_vm0, %v1322_v0  ;;  %v1543_v1 = vld [vmem:[%s1887_s2] sm:$0xff] (!%p248_p9)  ;;  %1298 = vset.pattern.permute.xlu0 (!%p248_p9), %v1426_v3  ;;  %v1565_v5 = vld [vmem:[%s1887_s2 + $0x18] sm:$0xff] (!%p248_p9)  ;;  %v1323_v9 = vld [vmem:[%s1886_s1 + $0x8] sm:$0xff] (!%p248_p9)   ;;  %v1427_v55 = vmov (!%p248_p9), 2   ;;  %s1428_s23 = smov (!%p248_p9), 0.0  }
  0x13   : > { %1299 = vset.pattern.permute.xlu1 (!%p248_p9), %v1426_v3  ;;  %304 = vperm.xlu0 (!%p248_p9), %1298, %v1543_v1   ;;  %s1429_s9 = smov (!%p248_p9), 1   ;;  %vm524_vm5 = vcmask (!%p248_p9), 15360   ;;  %s1436_s10 = smov (!%p248_p9), 124   ;;  %vm689_vm6 = vcmask (!%p248_p9), 1014784   ;;  %vm988_vm15 = vcmask (!%p248_p9), 261120  }
  0x14   : > { %314 = vperm.xlu1 (!%p248_p9), %1299, %v1548_v2   ;;  %s1437_s14 = smov (!%p248_p9), 126   ;;  %s1438_s15 = smov (!%p248_p9), 2  }
  0x17   : > { %309 = vperm.xlu0 (!%p248_p9), %1298, %v1560_v4  }
  0x18   : > { %319 = vperm.xlu1 (!%p248_p9), %1299, %v1565_v5  }
  0x19   : > { %s285_s16 = scalar_select %p284_p10, %s1507_s5, 1 }
  0x1b   : > { %s1203_s21 = sshll.u32 %s285_s16, 4  ;;  %s292_s16 = sld [smem:[#allocation3]]  ;;  %1300 = vset.pattern.permute.xlu0 %v1427_v55 }
  0x1c   : > { %s288_s24 = scalar_lea.vmem %s1885_s0, %s1203_s21  ;;  %1301 = vset.pattern.permute.xlu1 %v1427_v55 }
  0x1d   : > { %v1567_v6 = vld [vmem:[%s288_s24] sm:$0xff]  ;;  %v1569_v7 = vld [vmem:[%s288_s24 + $0x8] sm:$0xff] }
  0x1e   : > { %v301_v8 = vpack.c.bf16 %v1569_v7, %v1567_v6 }
  0x20   : > { %1213 = vmatprep.subr.bf16.mxu0 %v301_v8 }
  0x21   : > { %1214 = vmatpush3.bf16.msra.mxu0 %v301_v8  ;;  %v1579_v15 = vstv %s292_s16 }
  0x24   : > { %1216 = vmatmul.mubr.msk.bf16.vlgmr.msra.gmra.mrb[0].mxu0 %vm332_vm0, %v1323_v9 }
  0x92   : > { %v305_v11 = vpop.permute.xlu0 %304 }
  0x93   : > { %v315_v10 = vpop.permute.xlu1 %314 }
  0x96   : > { %v310_v19 = vpop.permute.xlu0 %309 }
  0x97   : > { %v320_v13 = vpop.permute.xlu1 %319 }
  0xf7   : > { %v1217_v12 = vpop.f32.mrb[0].mxu0 }
  0xf8   : > { %v382_v14 = vadd.f32 %v1217_v12, %v315_v10  ;;  %v373_v16 = vpop.f32.mrb[1].mxu0  ;;  %v1431_v12 = vmov 3  }
  0xf9   : > { %v374_v17 = vadd.f32 %v373_v16, %v305_v11  ;;  %v1218_v18 = vpop.f32.mrb[2].mxu0  ;;  %v1430_v11 = vmov 6  }
  0xfa   : > { %v385_v20 = vadd.f32 %v1218_v18, %v320_v13  ;;  %v376_v21 = vpop.f32.mrb[3].mxu0  ;;  %v395_v22 = vmul.f32 %v1579_v15, %v382_v14  ;;  %vm390_vm2 = vcmp.ge.f32.partialorder %v382_v14, 0.0  ;;  %v1432_v13 = vmov 5  }
  0xfb   : > { %vm388_vm1 = vcmp.ge.f32.partialorder %v374_v17, 0.0  ;;  %v393_v23 = vmul.f32 %v1579_v15, %v374_v17  ;;  %v377_v24 = vadd.f32 %v376_v21, %v310_v19 }
  0xfc   : > { %v396_v26 = vmul.f32 %v1579_v15, %v385_v20  ;;  %vm391_vm4 = vcmp.ge.f32.partialorder %v385_v20, 0.0  ;;  %v1587_v28 = vsel %vm390_vm2, %v382_v14, %v395_v22  ;;  %v1433_v14 = vmov 0.0  }
  0xfd   : > { %v1583_v25 = vsel %vm388_vm1, %v374_v17, %v393_v23  ;;  %vm389_vm3 = vcmp.ge.f32.partialorder %v377_v24, 0.0  ;;  %v394_v27 = vmul.f32 %v1579_v15, %v377_v24  ;;  %v415_v35 = vmul.f32 %v1587_v28, %v1587_v28  ;;  %525 = vst.msk [vmem:[#allocation2 + $0x10] sm:$0xff] %vm524_vm5, %v1433_v14  ;;  %526 = vst.msk [vmem:[#allocation2 + $0x28] sm:$0xff] %vm524_vm5, %v1433_v14 }
  0xfe   : > { %v413_v30 = vmul.f32 %v1583_v25, %v1583_v25  ;;  %v1597_v33 = vsel %vm391_vm4, %v385_v20, %v396_v26  ;;  %527 = vst.msk [vmem:[#allocation2 + $0x40] sm:$0xff] %vm524_vm5, %v1433_v14  ;;  %528 = vst.msk [vmem:[#allocation2 + $0x58] sm:$0xff] %vm524_vm5, %v1433_v14 }
  0xff   : > { %v1589_v29 = vsel %vm389_vm3, %v377_v24, %v394_v27  ;;  %v416_v38 = vmul.f32 %v1597_v33, %v1597_v33  ;;  %v1434_v24 = vmov 4  }
 0x100   : > { %v414_v31 = vmul.f32 %v1589_v29, %v1589_v29  ;;  %v401_v32 = vadd.f32 %v1589_v29, %v1583_v25 }
 0x102   : > { %v402_v34 = vadd.f32 %v401_v32, %v1587_v28  ;;  %v417_v36 = vadd.f32 %v414_v31, %v413_v30  ;;  %v1435_v30 = vmov 1  }
 0x104   : > { %v403_v37 = vadd.f32 %v402_v34, %v1597_v33  ;;  %v418_v39 = vadd.f32 %v417_v36, %v415_v35  ;;  %v634_v35 = vld [vmem:[#allocation2 + $0x10] sm:$0xff] }
 0x106   : > { %404 = vadd.xlane.f32.xlu0 %v403_v37  ;;  %v419_v40 = vadd.f32 %v418_v39, %v416_v38  ;;  %v636_v37 = vld [vmem:[#allocation2 + $0x28] sm:$0xff] }
 0x108   : > { %420 = vadd.xlane.f32.xlu1 %v419_v40 }
 0x193   : > { %v405_v41 = vpop.xlane.xlu0 %404 }
 0x194   : > { %v406_v42 = vrot.slane %v405_v41, 4 }
 0x195   : > { %v421_v43 = vpop.xlane.xlu1 %420 }
 0x196   : > { %v407_v44 = vadd.f32 %v406_v42, %v405_v41  ;;  %v422_v45 = vrot.slane %v421_v43, 4 }
 0x198   : > { %v408_v46 = vrot.slane %v407_v44, 2  ;;  %v423_v47 = vadd.f32 %v422_v45, %v421_v43 }
 0x19a   : > { %v424_v48 = vrot.slane %v423_v47, 2  ;;  %v409_v49 = vadd.f32 %v408_v46, %v407_v44 }
 0x19c   : > { %v410_v50 = vrot.slane %v409_v49, 1  ;;  %v425_v51 = vadd.f32 %v424_v48, %v423_v47 }
 0x19e   : > { %v411_v52 = vadd.f32 %v410_v50, %v409_v49  ;;  %v426_v53 = vrot.slane %v425_v51, 1 }
 0x1a0   : > { %1227 = vpush %v411_v52  ;;  %v427_v54 = vadd.f32 %v426_v53, %v425_v51 }
 0x1a2   : > { %1229 = vpush %v427_v54 }
 0x1d1   : > { %s1228_s17 = spop %1227 }
 0x1d2   : > { %s431_s18 = smul.f32 0.00024414063, %s1228_s17 }
 0x1d3   : > { %s1230_s19 = spop %1229 }
 0x1d4   : > { %s435_s20 = smul.f32 %s431_s18, %s431_s18  ;;  %v447_v61 = vstv %s431_s18 }
 0x1d5   : > { %s434_s21 = smul.f32 0.00024414063, %s1230_s19 }
 0x1d7   : > { %s436_s22 = ssub.f32 %s434_s21, %s435_s20 }
 0x1d9   : > { %s437_s24 = smax.f32 %s1428_s23, %s436_s22 }
 0x1da   : > { %s438_s25 = sadd.f32 1e-08, %s437_s24 }
 0x1dc   : > { %v439_v56 = vstv %s438_s25 }
 0x1dd   : > { %1326 = vrsqrt.f32 %v439_v56 }
 0x1e7   : > { %v1327_v57 = vpop.eup %1326 }
 0x1e8   : > { %1231 = vpush %v1327_v57 }
 0x219   : > { %s1232_s30 = spop %1231 }
 0x21a   : > { %v442_v58 = vstv %s1232_s30  ;;  %s1204_s30 = sshll.u32 %s1507_s5, 8 }
 0x21b   : > { %v443_v59 = vmul.f32 %v442_v58, %v1543_v1  ;;  %v444_v60 = vmul.f32 %v442_v58, %v1560_v4  ;;  %v445_v62 = vmul.f32 %v442_v58, %v1548_v2  ;;  %v446_v63 = vmul.f32 %v442_v58, %v1565_v5 }
 0x21d   : > { %v449_v0 = vmul.f32 %v447_v61, %v444_v60  ;;  %v448_v8 = vmul.f32 %v447_v61, %v443_v59  ;;  %v451_v9 = vmul.f32 %v447_v61, %v446_v63  ;;  %v450_v10 = vmul.f32 %v447_v61, %v445_v62 }
 0x21f   : > { %458 = vrot.lane.b32.xlu1 %v449_v0, %s1429_s9  ;;  %456 = vrot.lane.b32.xlu0 %v448_v8, %s1429_s9 }
 0x223   : > { %462 = vrot.lane.b32.xlu1 %v451_v9, %s1429_s9  ;;  %460 = vrot.lane.b32.xlu0 %v450_v10, %s1429_s9 }
 0x227   : > { %479 = vperm.xlu1 %1301, %v444_v60   ;;  %474 = vperm.xlu0 %1300, %v443_v59   ;;  %v640_v59 = vld [vmem:[#allocation2 + $0x58] sm:$0xff] }
 0x22b   : > { %484 = vperm.xlu1 %1301, %v445_v62   ;;  %1304 = vset.pattern.permute.xlu0 %v1430_v11 }
 0x22c   : > { %646 = vperm.xlu0 %1304, %v1560_v4  }
 0x22f   : > { %489 = vperm.xlu1 %1301, %v446_v63  }
 0x230   : > { %1305 = vset.pattern.permute.xlu0 %v1431_v12 }
 0x233   : > { %1302 = vset.pattern.permute.xlu1 %v1432_v13 }
 0x234   : > { %594 = vperm.xlu1 %1302, %v1560_v4  }
 0x238   : > { %1303 = vset.pattern.permute.xlu1 %v1430_v11 }
 0x239   : > { %642 = vperm.xlu1 %1303, %v1543_v1  }
 0x23d   : > { %1306 = vset.pattern.permute.xlu1 %v1431_v12 }
 0x291   : > { %v459_v16 = vpop.permute.xlu1 %458  ;;  %v457_v17 = vpop.permute.xlu0 %456 }
 0x292   : > { %v469_v18 = vsub.f32 %v1560_v4, %v459_v16  ;;  %v468_v19 = vsub.f32 %v1543_v1, %v457_v17 }
 0x294   : > { %503 = vperm.xlu1 %1306, %v469_v18   ;;  %498 = vperm.xlu0 %1305, %v468_v19  }
 0x295   : > { %v463_v20 = vpop.permute.xlu1 %462  ;;  %v461_v21 = vpop.permute.xlu0 %460 }
 0x296   : > { %v471_v22 = vsub.f32 %v1565_v5, %v463_v20  ;;  %v470_v23 = vsub.f32 %v1548_v2, %v461_v21 }
 0x298   : > { %513 = vperm.xlu1 %1306, %v471_v22   ;;  %508 = vperm.xlu0 %1305, %v470_v23  }
 0x29c   : > { %1308 = vset.pattern.permute.xlu1 %v1432_v13  ;;  %1307 = vset.pattern.permute.xlu0 %v1432_v13 }
 0x29d   : > { %598 = vperm.xlu1 %1308, %v1548_v2   ;;  %590 = vperm.xlu0 %1307, %v1543_v1  }
 0x2a1   : > { %1309 = vset.pattern.permute.xlu1 %v1430_v11  ;;  %602 = vperm.xlu0 %1307, %v1565_v5  }
 0x2a2   : > { %650 = vperm.xlu1 %1309, %v1548_v2  }
 0x2a5   : > { %1311 = vset.pattern.permute.xlu0 %v1434_v24 }
 0x2a6   : > { %654 = vperm.xlu1 %1309, %v1565_v5   ;;  %v480_v26 = vpop.permute.xlu1 %479  ;;  %546 = vperm.xlu0 %1311, %v1560_v4   ;;  %v475_v34 = vpop.permute.xlu0 %474 }
 0x2a7   : > { %v493_v41 = vmul.f32 %v480_v26, %v1589_v29  ;;  %v492_v42 = vmul.f32 %v475_v34, %v1583_v25 }
 0x2aa   : > { %1310 = vset.pattern.permute.xlu1 %v1434_v24  ;;  %v485_v27 = vpop.permute.xlu1 %484  ;;  %1313 = vset.pattern.permute.xlu0 %v1435_v30 }
 0x2ab   : > { %542 = vperm.xlu1 %1310, %v1543_v1   ;;  %570 = vperm.xlu0 %1313, %v1560_v4   ;;  %v647_v39 = vpop.permute.xlu0 %646  ;;  %v494_v47 = vmul.f32 %v485_v27, %v1587_v28 }
 0x2ac   : > { %v660_v40 = vmul.f32 %v647_v39, %v636_v37 }
 0x2ae   : > { %v490_v31 = vpop.permute.xlu1 %489 }
 0x2af   : > { %550 = vperm.xlu1 %1310, %v1548_v2   ;;  %578 = vperm.xlu0 %1313, %v1565_v5   ;;  %v495_v48 = vmul.f32 %v490_v31, %v1597_v33 }
 0x2b3   : > { %1312 = vset.pattern.permute.xlu1 %v1435_v30  ;;  %v595_v32 = vpop.permute.xlu1 %594  ;;  %1317 = vset.pattern.permute.xlu0 %v1427_v55 }
 0x2b4   : > { %566 = vperm.xlu1 %1312, %v1543_v1  }
 0x2b8   : > { %1314 = vset.pattern.permute.xlu1 %v1434_v24  ;;  %v643_v36 = vpop.permute.xlu1 %642 }
 0x2b9   : > { %554 = vperm.xlu1 %1314, %v1565_v5   ;;  %v658_v38 = vmul.f32 %v643_v36, %v634_v35 }
 0x2bb   : > { %675 = vrot.lane.b32.xlu0 %v658_v38, %s1436_s10 }
 0x2bd   : > { %1315 = vset.pattern.permute.xlu1 %v1435_v30 }
 0x2be   : > { %574 = vperm.xlu1 %1315, %v1548_v2  }
 0x2bf   : > { %679 = vrot.lane.b32.xlu0 %v660_v40, %s1436_s10 }
 0x2c2   : > { %1316 = vset.pattern.permute.xlu1 %v1427_v55  ;;  %v638_v55 = vld [vmem:[#allocation2 + $0x40] sm:$0xff] }
 0x313   : > { %v504_v43 = vpop.permute.xlu1 %503  ;;  %v499_v44 = vpop.permute.xlu0 %498 }
 0x314   : > { %v517_v45 = vadd.f32 %v504_v43, %v493_v41  ;;  %v516_v46 = vadd.f32 %v499_v44, %v492_v42 }
 0x316   : > { %v606_v49 = vmul.f32 %v595_v32, %v517_v45  ;;  %v657_v62 = vmul.f32 %v643_v36, %v516_v46  ;;  %v659_v63 = vmul.f32 %v647_v39, %v517_v45 }
 0x317   : > { %v514_v50 = vpop.permute.xlu1 %513  ;;  %v509_v51 = vpop.permute.xlu0 %508 }
 0x318   : > { %v1650_v52 = vadd.f32 %v514_v50, %v495_v48  ;;  %v518_v53 = vadd.f32 %v509_v51, %v494_v47  ;;  %615 = vrot.lane.b32.xlu0 %v606_v49, %s1437_s14 }
 0x31c   : > { %v599_v54 = vpop.permute.xlu1 %598  ;;  %v591_v29 = vpop.permute.xlu0 %590 }
 0x31d   : > { %v605_v28 = vmul.f32 %v591_v29, %v516_v46  ;;  %v607_v0 = vmul.f32 %v599_v54, %v518_v53 }
 0x320   : > { %v603_v58 = vpop.permute.xlu0 %602 }
 0x321   : > { %v651_v25 = vpop.permute.xlu1 %650  ;;  %v608_v33 = vmul.f32 %v603_v58, %v1650_v52 }
 0x322   : > { %v661_v56 = vmul.f32 %v651_v25, %v518_v53  ;;  %v662_v57 = vmul.f32 %v651_v25, %v638_v55 }
 0x324   : > { %683 = vrot.lane.b32.xlu1 %v662_v57, %s1436_s10  ;;  %681 = vrot.lane.b32.xlu0 %v661_v56, %s1436_s10 }
 0x325   : > { %v655_v60 = vpop.permute.xlu1 %654  ;;  %v547_v10 = vpop.permute.xlu0 %546 }
 0x326   : > { %v664_v61 = vmul.f32 %v655_v60, %v640_v59  ;;  %v663_v8 = vmul.f32 %v655_v60, %v1650_v52  ;;  %v559_v23 = vmul.f32 0.0, %v547_v10  ;;  %v560_v35 = vmul.f32 %v547_v10, %v517_v45 }
 0x328   : > { %613 = vrot.lane.b32.xlu1 %v605_v28, %s1437_s14  ;;  %619 = vrot.lane.b32.xlu0 %v608_v33, %s1437_s14 }
 0x32a   : > { %v543_v9 = vpop.permute.xlu1 %542  ;;  %v571_v13 = vpop.permute.xlu0 %570 }
 0x32b   : > { %v557_v22 = vmul.f32 0.0, %v543_v9  ;;  %v558_v24 = vmul.f32 %v543_v9, %v516_v46  ;;  %v583_v32 = vadd.f32 %v571_v13, %v559_v23  ;;  %v584_v41 = vadd.f32 %v571_v13, %v560_v35 }
 0x32c   : > { %673 = vrot.lane.b32.xlu1 %v657_v62, %s1436_s10  ;;  %687 = vrot.lane.b32.xlu0 %v664_v61, %s1436_s10 }
 0x32e   : > { %v551_v11 = vpop.permute.xlu1 %550  ;;  %v579_v16 = vpop.permute.xlu0 %578 }
 0x32f   : > { %v561_v43 = vmul.f32 0.0, %v551_v11  ;;  %v562_v47 = vmul.f32 %v551_v11, %v518_v53 }
 0x330   : > { %677 = vrot.lane.b32.xlu1 %v659_v63, %s1436_s10 }
 0x332   : > { %v676_v18 = vpop.permute.xlu0 %675 }
 0x333   : > { %v567_v14 = vpop.permute.xlu1 %566 }
 0x334   : > { %617 = vrot.lane.b32.xlu1 %v607_v0, %s1437_s14  ;;  %v581_v30 = vadd.f32 %v567_v14, %v557_v22  ;;  %v582_v31 = vadd.f32 %v567_v14, %v558_v24 }
 0x336   : > { %v680_v20 = vpop.permute.xlu0 %679 }
 0x338   : > { %685 = vrot.lane.b32.xlu1 %v663_v8, %s1436_s10  ;;  %v555_v17 = vpop.permute.xlu1 %554 }
 0x339   : > { %v563_v50 = vmul.f32 0.0, %v555_v17  ;;  %v564_v55 = vmul.f32 %v555_v17, %v1650_v52 }
 0x33b   : > { %v587_v59 = vadd.f32 %v579_v16, %v563_v50  ;;  %v588_v63 = vadd.f32 %v579_v16, %v564_v55 }
 0x33d   : > { %v575_v19 = vpop.permute.xlu1 %574 }
 0x33e   : > { %v585_v57 = vadd.f32 %v575_v19, %v561_v43  ;;  %v586_v58 = vadd.f32 %v575_v19, %v562_v47 }
 0x38a   : > { %v616_v26 = vpop.permute.xlu0 %615 }
 0x38b   : > { %v627_v44 = vadd.f32 %v616_v26, %v583_v32  ;;  %v628_v48 = vadd.f32 %v616_v26, %v584_v41 }
 0x396   : > { %v684_v21 = vpop.permute.xlu1 %683  ;;  %v682_v36 = vpop.permute.xlu0 %681 }
 0x397   : > { %v692_v0 = vsel %vm689_vm6, %v682_v36, %v684_v21 }
 0x39a   : > { %v614_v27 = vpop.permute.xlu1 %613  ;;  %v620_v25 = vpop.permute.xlu0 %619 }
 0x39b   : > { %v625_v34 = vadd.f32 %v614_v27, %v581_v30  ;;  %v626_v37 = vadd.f32 %v614_v27, %v582_v31  ;;  %v631_v9 = vadd.f32 %v620_v25, %v587_v59  ;;  %v632_v13 = vadd.f32 %v620_v25, %v588_v63 }
 0x39e   : > { %v674_v38 = vpop.permute.xlu1 %673  ;;  %v688_v14 = vpop.permute.xlu0 %687 }
 0x39f   : > { %v690_v39 = vsel %vm689_vm6, %v674_v38, %v676_v18  ;;  %v702_v40 = vadd.f32 %v674_v38, %v625_v34 }
 0x3a0   : > { %v703_v42 = vadd.f32 %v690_v39, %v626_v37 }
 0x3a1   : > { %vm710_vm7 = vcmp.ge.f32.partialorder %v702_v40, 0.0  ;;  %v718_v46 = vmul.f32 %v702_v40, %v1579_v15 }
 0x3a2   : > { %v678_v49 = vpop.permute.xlu1 %677  ;;  %vm711_vm8 = vcmp.ge.f32.partialorder %v703_v42, 0.0  ;;  %v719_v45 = vmul.f32 %v703_v42, %v1579_v15 }
 0x3a3   : > { %v691_v51 = vsel %vm689_vm6, %v678_v49, %v680_v20  ;;  %v704_v54 = vadd.f32 %v678_v49, %v627_v44  ;;  %v1664_v29 = vsel %vm710_vm7, %v702_v40, %v718_v46 }
 0x3a4   : > { %v705_v56 = vadd.f32 %v691_v51, %v628_v48  ;;  %742 = vrot.lane.b32.xlu1 %v1664_v29, %s1438_s15  ;;  %v1669_v53 = vsel %vm711_vm8, %v703_v42, %v719_v45  ;;  %v778_v31 = vmul.f32 %v1664_v29, %v1664_v29 }
 0x3a5   : > { %744 = vrot.lane.b32.xlu0 %v1669_v53, %s1438_s15  ;;  %vm712_vm9 = vcmp.ge.f32.partialorder %v704_v54, 0.0  ;;  %v720_v28 = vmul.f32 %v704_v54, %v1579_v15  ;;  %v779_v32 = vmul.f32 %v1669_v53, %v1669_v53 }
 0x3a6   : > { %v618_v33 = vpop.permute.xlu1 %617  ;;  %vm713_vm10 = vcmp.ge.f32.partialorder %v705_v56, 0.0  ;;  %v721_v52 = vmul.f32 %v705_v56, %v1579_v15 }
 0x3a7   : > { %v629_v60 = vadd.f32 %v618_v33, %v585_v57  ;;  %v630_v61 = vadd.f32 %v618_v33, %v586_v58  ;;  %v1675_v62 = vsel %vm712_vm9, %v704_v54, %v720_v28 }
 0x3a8   : > { %746 = vrot.lane.b32.xlu1 %v1675_v62, %s1438_s15  ;;  %v1680_v8 = vsel %vm713_vm10, %v705_v56, %v721_v52 }
 0x3a9   : > { %v706_v10 = vadd.f32 %v682_v36, %v629_v60  ;;  %v707_v11 = vadd.f32 %v692_v0, %v630_v61  ;;  %748 = vrot.lane.b32.xlu0 %v1680_v8, %s1438_s15  ;;  %v781_v34 = vmul.f32 %v1680_v8, %v1680_v8 }
 0x3aa   : > { %v686_v17 = vpop.permute.xlu1 %685 }
 0x3ab   : > { %v693_v18 = vsel %vm689_vm6, %v686_v17, %v688_v14  ;;  %v708_v19 = vadd.f32 %v686_v17, %v631_v9  ;;  %vm714_vm11 = vcmp.ge.f32.partialorder %v706_v10, 0.0  ;;  %v722_v16 = vmul.f32 %v706_v10, %v1579_v15 }
 0x3ac   : > { %v709_v20 = vadd.f32 %v693_v18, %v632_v13  ;;  %vm715_vm12 = vcmp.ge.f32.partialorder %v707_v11, 0.0  ;;  %v723_v21 = vmul.f32 %v707_v11, %v1579_v15 }
 0x3ad   : > { %v1687_v22 = vsel %vm714_vm11, %v706_v10, %v722_v16  ;;  %v724_v23 = vmul.f32 %v708_v19, %v1579_v15  ;;  %vm716_vm13 = vcmp.ge.f32.partialorder %v708_v19, 0.0 }
 0x3ae   : > { %750 = vrot.lane.b32.xlu1 %v1687_v22, %s1438_s15  ;;  %v1692_v24 = vsel %vm715_vm12, %v707_v11, %v723_v21  ;;  %vm717_vm14 = vcmp.ge.f32.partialorder %v709_v20, 0.0  ;;  %v725_v26 = vmul.f32 %v709_v20, %v1579_v15  ;;  %v780_v15 = vmul.f32 %v1675_v62, %v1675_v62 }
 0x3af   : > { %752 = vrot.lane.b32.xlu0 %v1692_v24, %s1438_s15  ;;  %v1699_v30 = vsel %vm716_vm13, %v708_v19, %v724_v23  ;;  %v782_v35 = vmul.f32 %v1687_v22, %v1687_v22  ;;  %v783_v36 = vmul.f32 %v1692_v24, %v1692_v24 }
 0x3b0   : > { %v1697_v27 = vsel %vm717_vm14, %v709_v20, %v725_v26  ;;  %v784_v37 = vmul.f32 %v1699_v30, %v1699_v30 }
 0x3b1   : > { %v785_v38 = vmul.f32 %v1697_v27, %v1697_v27 }
 0x3b2   : > { %754 = vrot.lane.b32.xlu1 %v1699_v30, %s1438_s15 }
 0x3b3   : > { %756 = vrot.lane.b32.xlu0 %v1697_v27, %s1438_s15 }
 0x3b6   : > { %794 = vrot.lane.b32.xlu1 %v778_v31, %s1438_s15 }
 0x3b7   : > { %796 = vrot.lane.b32.xlu0 %v779_v32, %s1438_s15 }
 0x3ba   : > { %798 = vrot.lane.b32.xlu1 %v780_v15, %s1438_s15 }
 0x3bb   : > { %800 = vrot.lane.b32.xlu0 %v781_v34, %s1438_s15 }
 0x3be   : > { %802 = vrot.lane.b32.xlu1 %v782_v35, %s1438_s15 }
 0x3bf   : > { %804 = vrot.lane.b32.xlu0 %v783_v36, %s1438_s15 }
 0x3c2   : > { %806 = vrot.lane.b32.xlu1 %v784_v37, %s1438_s15 }
 0x3c3   : > { %808 = vrot.lane.b32.xlu0 %v785_v38, %s1438_s15 }
 0x416   : > { %v743_v39 = vpop.permute.xlu1 %742 }
 0x417   : > { %v745_v40 = vpop.permute.xlu0 %744 }
 0x418   : > { %v758_v47 = vsel %vm524_vm5, %v743_v39, %v745_v40 }
 0x41a   : > { %v747_v42 = vpop.permute.xlu1 %746 }
 0x41b   : > { %v749_v41 = vpop.permute.xlu0 %748 }
 0x41c   : > { %v759_v43 = vsel %vm524_vm5, %v747_v42, %v749_v41 }
 0x41d   : > { %v766_v49 = vadd.f32 %v759_v43, %v758_v47 }
 0x420   : > { %v751_v44 = vpop.permute.xlu1 %750 }
 0x421   : > { %v753_v46 = vpop.permute.xlu0 %752 }
 0x422   : > { %v760_v48 = vsel %vm524_vm5, %v751_v44, %v753_v46 }
 0x423   : > { %v767_v50 = vadd.f32 %v766_v49, %v760_v48 }
 0x424   : > { %v755_v45 = vpop.permute.xlu1 %754 }
 0x425   : > { %v757_v51 = vpop.permute.xlu0 %756 }
 0x426   : > { %v761_v54 = vsel %vm524_vm5, %v755_v45, %v757_v51 }
 0x427   : > { %v768_v55 = vadd.f32 %v767_v50, %v761_v54 }
 0x428   : > { %v795_v25 = vpop.permute.xlu1 %794 }
 0x429   : > { %769 = vadd.xlane.f32.xlu1 %v768_v55  ;;  %v797_v56 = vpop.permute.xlu0 %796 }
 0x42a   : > { %v810_v59 = vsel %vm524_vm5, %v795_v25, %v797_v56 }
 0x42c   : > { %v799_v57 = vpop.permute.xlu1 %798 }
 0x42d   : > { %v801_v58 = vpop.permute.xlu0 %800 }
 0x42e   : > { %v811_v28 = vsel %vm524_vm5, %v799_v57, %v801_v58 }
 0x42f   : > { %v818_v61 = vadd.f32 %v811_v28, %v810_v59 }
 0x430   : > { %v803_v33 = vpop.permute.xlu1 %802 }
 0x431   : > { %v805_v52 = vpop.permute.xlu0 %804 }
 0x432   : > { %v812_v60 = vsel %vm524_vm5, %v803_v33, %v805_v52 }
 0x433   : > { %v819_v0 = vadd.f32 %v818_v61, %v812_v60 }
 0x434   : > { %v807_v63 = vpop.permute.xlu1 %806 }
 0x435   : > { %v809_v9 = vpop.permute.xlu0 %808 }
 0x436   : > { %v813_v10 = vsel %vm524_vm5, %v807_v63, %v809_v9 }
 0x437   : > { %v820_v11 = vadd.f32 %v819_v0, %v813_v10 }
 0x439   : > { %821 = vadd.xlane.f32.xlu0 %v820_v11 }
 0x4b6   : > { %v770_v13 = vpop.xlane.xlu1 %769 }
 0x4b7   : > { %v771_v14 = vrot.slane %v770_v13, 4 }
 0x4b9   : > { %v772_v17 = vadd.f32 %v771_v14, %v770_v13 }
 0x4bb   : > { %v773_v18 = vrot.slane %v772_v17, 2 }
 0x4bd   : > { %v774_v19 = vadd.f32 %v773_v18, %v772_v17 }
 0x4bf   : > { %v775_v16 = vrot.slane %v774_v19, 1 }
 0x4c1   : > { %v776_v20 = vadd.f32 %v775_v16, %v774_v19 }
 0x4c3   : > { %1233 = vpush %v776_v20 }
 0x4c6   : > { %v822_v21 = vpop.xlane.xlu0 %821 }
 0x4c7   : > { %v823_v23 = vrot.slane %v822_v21, 4 }
 0x4c9   : > { %v824_v26 = vadd.f32 %v823_v23, %v822_v21 }
 0x4cb   : > { %v825_v31 = vrot.slane %v824_v26, 2 }
 0x4cd   : > { %v826_v32 = vadd.f32 %v825_v31, %v824_v26 }
 0x4cf   : > { %v827_v15 = vrot.slane %v826_v32, 1 }
 0x4d1   : > { %v828_v34 = vadd.f32 %v827_v15, %v826_v32  ;;  %v1325_v32 = vld [vmem:[%s1888_s3 + $0x8] sm:$0xff]  }
 0x4d3   : > { %1235 = vpush %v828_v34 }
 0x4f4   : > { %s1234_s16 = spop %1233 }
 0x4f5   : > { %s832_s17 = smul.f32 0.00024414063, %s1234_s16  ;;  %s1801_s16 = scalar_lea.hbm %s1892_s7, %s1204_s30 }
 0x4f7   : > { %s836_s18 = smul.f32 %s832_s17, %s832_s17  ;;  %v848_v40 = vstv %s832_s17 }
 0x504   : > { %s1236_s19 = spop %1235 }
 0x505   : > { %s835_s20 = smul.f32 0.00024414063, %s1236_s19  ;;  %s1809_s19 = scalar_lea.hbm %s1891_s6, %s1204_s30 }
 0x507   : > { %s837_s21 = ssub.f32 %s835_s20, %s836_s18 }
 0x509   : > { %s838_s22 = smax.f32 %s1428_s23, %s837_s21  ;;  %s1439_s21 = smov [#allocation6]  }
 0x50a   : > { %s839_s24 = sadd.f32 1e-08, %s838_s22  ;;  %s1789_s22 = sand.u32 1, %s1416_s27  }
 0x50b   : > { %s1056_s20 = scalar_lea.sflag [#allocation7], %s1789_s22 }
 0x50c   : > { %v840_v35 = vstv %s839_s24  ;;  %s1183_s24 = sshll.u32 %s1789_s22, 4 }
 0x50d   : > { %1328 = vrsqrt.f32 %v840_v35 }
 0x517   : > { %v1329_v36 = vpop.eup %1328 }
 0x518   : > { %1237 = vpush %v1329_v36 }
 0x549   : > { %s1238_s25 = spop %1237 }
 0x54a   : > { %v843_v37 = vstv %s1238_s25  ;;  %s283_s25 = scalar_lea.vmem [#allocation6], %s1183_s24 }
 0x54b   : > { %v844_v38 = vmul.f32 %v843_v37, %v1543_v1  ;;  %v845_v39 = vmul.f32 %v843_v37, %v1560_v4  ;;  %v846_v41 = vmul.f32 %v843_v37, %v1548_v2  ;;  %v847_v42 = vmul.f32 %v843_v37, %v1565_v5  ;;  %s1085_s23 = sshll.u32 %s283_s25, 4  ;;  %s1793_s23 = int_to_ptr.vmem [resolvable:$true] %s1085_s23 }
 0x54d   : > { %v850_v43 = vmul.f32 %v848_v40, %v845_v39  ;;  %v849_v44 = vmul.f32 %v848_v40, %v844_v38  ;;  %v851_v46 = vmul.f32 %v848_v40, %v846_v41  ;;  %v852_v47 = vmul.f32 %v848_v40, %v847_v42 }
 0x54f   : > { %859 = vrot.lane.b32.xlu1 %v850_v43, %s1429_s9  ;;  %857 = vrot.lane.b32.xlu0 %v849_v44, %s1429_s9 }
 0x553   : > { %861 = vrot.lane.b32.xlu1 %v851_v46, %s1429_s9  ;;  %863 = vrot.lane.b32.xlu0 %v852_v47, %s1429_s9  ;;  %s1795_s9 = scalar_lea.vmem [#allocation4], %s1183_s24  ;;  %s1334_s24 = sshll.u32 %s1439_s21, 4  ;;  %s1335_s24 = int_to_ptr.vmem [resolvable:$false] %s1334_s24 }
 0x554   : > { %s1069_s10 = sshll.u32 %s1795_s9, 4  ;;  %s1336_s5 = scalar_lea.vmem %s1335_s24, 512  ;;  %s1804_s10 = int_to_ptr.vmem [resolvable:$true] %s1069_s10 }
 0x555   : > { %p1337_p0 = scmp.lt.s32.totalorder %s1793_s23, %s1335_s24 }
 0x557   : > { %875 = vperm.xlu1 %1316, %v844_v38   ;;  %880 = vperm.xlu0 %1317, %v845_v39  }
 0x55b   : > { %890 = vperm.xlu1 %1316, %v847_v42   ;;  %885 = vperm.xlu0 %1317, %v846_v41  }
 0x55f   : > { %1318 = vset.pattern.permute.xlu1 %v1431_v12  ;;  %1319 = vset.pattern.permute.xlu0 %v1431_v12 }
 0x5c1   : > { %v860_v48 = vpop.permute.xlu1 %859  ;;  %v858_v49 = vpop.permute.xlu0 %857 }
 0x5c2   : > { %v869_v45 = vsub.f32 %v1543_v1, %v858_v49  ;;  %v870_v51 = vsub.f32 %v1560_v4, %v860_v48  ;;  %v1324_v4 = vld [vmem:[%s1888_s3] sm:$0xff]  }
 0x5c3   : > { %1223 = vmatprep.mubr.msk.bf16.mxu1 %vm988_vm15, %v1324_v4 }
 0x5c4   : > { %903 = vperm.xlu1 %1318, %v869_v45  }
 0x5c5   : > { %v862_v50 = vpop.permute.xlu1 %861  ;;  %v864_v55 = vpop.permute.xlu0 %863 }
 0x5c6   : > { %v871_v54 = vsub.f32 %v1548_v2, %v862_v50  ;;  %v872_v25 = vsub.f32 %v1565_v5, %v864_v55 }
 0x5c8   : > { %913 = vperm.xlu0 %1319, %v871_v54   ;;  %908 = vperm.xlu1 %1318, %v870_v51  }
 0x5cc   : > { %918 = vperm.xlu1 %1318, %v872_v25   ;;  %1321 = vset.pattern.permute.xlu0 %v1426_v3 }
 0x5d0   : > { %1320 = vset.pattern.permute.xlu1 %v1426_v3 }
 0x5d6   : > { %v876_v12 = vpop.permute.xlu1 %875  ;;  %v881_v56 = vpop.permute.xlu0 %880 }
 0x5d7   : > { %v893_v2 = vmul.f32 %v876_v12, %v1664_v29  ;;  %v894_v28 = vmul.f32 %v876_v12, %v1669_v53  ;;  %v895_v5 = vmul.f32 %v881_v56, %v1675_v62  ;;  %v896_v33 = vmul.f32 %v881_v56, %v1680_v8 }
 0x5da   : > { %v891_v57 = vpop.permute.xlu1 %890  ;;  %v886_v58 = vpop.permute.xlu0 %885 }
 0x5db   : > { %v899_v0 = vmul.f32 %v891_v57, %v1699_v30  ;;  %v897_v9 = vmul.f32 %v886_v58, %v1687_v22  ;;  %v900_v29 = vmul.f32 %v891_v57, %v1697_v27  ;;  %v898_v53 = vmul.f32 %v886_v58, %v1692_v24  ;;  %v937_v22 = vld [vmem:[%s1889_s4] sm:$0xff]  ;;  %v938_v24 = vld [vmem:[%s1889_s4 + $0x8] sm:$0xff]  ;;  %v939_v27 = vld [vmem:[%s1889_s4 + $0x10] sm:$0xff] }
 0x5dc   : > { %v940_v30 = vld [vmem:[%s1889_s4 + $0x18] sm:$0xff] }
 0x643   : > { %v904_v1 = vpop.permute.xlu1 %903 }
 0x644   : > { %v921_v3 = vadd.f32 %v904_v1, %v893_v2  ;;  %v922_v59 = vadd.f32 %v904_v1, %v894_v28 }
 0x647   : > { %v909_v52 = vpop.permute.xlu1 %908  ;;  %v914_v63 = vpop.permute.xlu0 %913 }
 0x648   : > { %v923_v60 = vadd.f32 %v909_v52, %v895_v5  ;;  %v924_v61 = vadd.f32 %v909_v52, %v896_v33  ;;  %v925_v11 = vadd.f32 %v914_v63, %v897_v9  ;;  %v926_v13 = vadd.f32 %v914_v63, %v898_v53 }
 0x64a   : > { %v933_v10 = vpack.c.bf16 %v923_v60, %v921_v3  ;;  %v934_v62 = vpack.c.bf16 %v924_v61, %v922_v59 }
 0x64b   : > { %v919_v8 = vpop.permute.xlu1 %918 }
 0x64c   : > { %v927_v14 = vadd.f32 %v919_v8, %v899_v0  ;;  %v928_v17 = vadd.f32 %v919_v8, %v900_v29  ;;  %977 = vrot.lane.b32.xlu0 %v934_v62, %s1438_s15  ;;  %975 = vrot.lane.b32.xlu1 %v933_v10, %s1438_s15 }
 0x64e   : > { %v935_v18 = vpack.c.bf16 %v927_v14, %v925_v11  ;;  %v936_v19 = vpack.c.bf16 %v928_v17, %v926_v13 }
 0x650   : > { %981 = vrot.lane.b32.xlu0 %v936_v19, %s1438_s15  ;;  %979 = vrot.lane.b32.xlu1 %v935_v18, %s1438_s15  ;;  %s1330_s15 = scalar_lea.vmem %s1793_s23, 256 }
 0x651   : > { %p1331_p11 = scmp.ne.s32.totalorder %s1793_s23, %s1330_s15  ;;  %p1338_p1 = scmp.lt.s32.totalorder %s1336_s5, %s1330_s15 }
 0x653   : > { %p1332_p12 = pnand %p1331_p11, %p1524_p5  ;;  %p1339_p2 = por %p1338_p1, %p1337_p0 }
 0x654   : > { %943 = vperm.xlu1 %1320, %v937_v22   ;;  %948 = vperm.xlu0 %1321, %v938_v24  }
 0x655   : > { %p1333_p13 = pneg %p1332_p12 }
 0x657   : > { %p1340_p3 = pnand %p1339_p2, %p1333_p13 }
 0x658   : > { %953 = vperm.xlu1 %1320, %v939_v27  }
 0x65c   : > { %958 = vperm.xlu1 %1320, %v940_v30  }
 0x6be   : > { %v976_v16 = vpop.permute.xlu1 %975  ;;  %v978_v20 = vpop.permute.xlu0 %977 }
 0x6bf   : > { %v984_v21 = vsel %vm524_vm5, %v976_v16, %v978_v20 }
 0x6c0   : > { %1219 = vmatprep.subr.bf16.mxu1 %v984_v21 }
 0x6c1   : > { %1220 = vmatpush3.bf16.msra.mxu1 %v984_v21 }
 0x6c2   : > { %v980_v23 = vpop.permute.xlu1 %979  ;;  %v982_v26 = vpop.permute.xlu0 %981 }
 0x6c3   : > { %v985_v31 = vsel %vm524_vm5, %v980_v23, %v982_v26 }
 0x6c4   : > { %1221 = vmatprep.subr.bf16.mxu1 %v985_v31 }
 0x6c5   : > { %1222 = vmatpush3.bf16.msra.mxu1 %v985_v31 }
 0x6c8   : > { %1224 = vmatmul.mubr.msk.bf16.vlgmr.msra.gmra.mrb[0].mxu1 %vm988_vm15, %v1325_v32 }
 0x6d3   : > { %v944_v15 = vpop.permute.xlu1 %943  ;;  %v949_v38 = vpop.permute.xlu0 %948 }
 0x6d7   : > { %v954_v34 = vpop.permute.xlu1 %953 }
 0x6db   : > { %v959_v39 = vpop.permute.xlu1 %958 }
 0x79b   : > { %v1225_v35 = vpop.f32.mrb[0].mxu1 }
 0x79c   : > { %v1038_v36 = vadd.f32 %v1225_v35, %v954_v34  ;;  %v1029_v37 = vpop.f32.mrb[1].mxu1 }
 0x79d   : > { %v1030_v40 = vadd.f32 %v1029_v37, %v944_v15  ;;  %v1226_v41 = vpop.f32.mrb[2].mxu1 }
 0x79e   : > { %1048 = vst [vmem:[%s283_s25] sm:$0xff] %v1038_v36  ;;  %v1041_v42 = vadd.f32 %v1226_v41, %v959_v39  ;;  %v1032_v43 = vpop.f32.mrb[3].mxu1 }
 0x79f   : > { %v1044_v44 = vadd.f32 %v1030_v40, %v1567_v6  ;;  %v1033_v46 = vadd.f32 %v1032_v43, %v949_v38 }
 0x7a0   : > { %1049 = vst [vmem:[%s283_s25 + $0x8] sm:$0xff] %v1041_v42 }
 0x7a1   : > { %1046 = vst [vmem:[%s1795_s9] sm:$0xff] %v1044_v44  ;;  %v1045_v47 = vadd.f32 %v1033_v46, %v1569_v7 }
 0x7a2   : > { %1343 = shalt.err (!%p1340_p3)
}
 0x7a3   : > { %s1344_s25 = scalar_lea.hbm %s1801_s16, 256  ;;  %s1348_s17 = scalar_lea.hbm %s1892_s7, 512 }
 0x7a4   : > { %p1345_p4 = scmp.ne.s32.totalorder %s1801_s16, %s1344_s25  ;;  %p1349_p9 = scmp.lt.u32.totalorder %s1801_s16, %s1892_s7 }
 0x7a5   : > { %p1350_p10 = scmp.lt.u32.totalorder %s1348_s17, %s1344_s25  ;;  %p1352_p12 = scmp.lt.u32.totalorder %s1344_s25, %s1801_s16 }
 0x7a6   : > { %p1346_p7 = pnand %p1345_p4, %p1524_p5 }
 0x7a7   : > { %p1351_p11 = por %p1350_p10, %p1349_p9 }
 0x7a8   : > { %p1347_p8 = pneg %p1346_p7 }
 0x7a9   : > { %p1353_p13 = por %p1352_p12, %p1351_p11 }
 0x7ab   : > { %p1354_p0 = pnand %p1353_p13, %p1347_p8 }
 0x7ad   : > { %1357 = shalt.err (!%p1354_p0)
}
 0x7ae   : > { %s1440_s15 = smov 128   ;;  %s1441_s24 = smov 8   ;;  %1047 = vst [vmem:[%s1795_s9 + $0x8] sm:$0xff] %v1045_v47 }
 0x7af   : > { %1240 = dma.vmem_to_hbm [thread:$0]  (%p1524_p5), %s1793_s23, 256, %s1801_s16, %s1056_s20, %s1440_s15, %s1440_s15, %s1441_s24  }
 0x7b0   : > { %s1051_s5 = scalar_lea.sflag [#allocation5], %s1789_s22  ;;  %s1358_s25 = scalar_lea.vmem %s1804_s10, 256 }
 0x7b1   : > { %p1359_p1 = scmp.ne.s32.totalorder %s1804_s10, %s1358_s25  ;;  %s1442_s30 = smov [#allocation4]  }
 0x7b2   : > { %s1362_s14 = sshll.u32 %s1442_s30, 4  ;;  %s1363_s14 = int_to_ptr.vmem [resolvable:$false] %s1362_s14 }
 0x7b3   : > { %p1360_p2 = pnand %p1359_p1, %p1524_p5  ;;  %s1364_s17 = scalar_lea.vmem %s1363_s14, 512 }
 0x7b4   : > { %p1365_p4 = scmp.lt.s32.totalorder %s1804_s10, %s1363_s14  ;;  %p1366_p7 = scmp.lt.s32.totalorder %s1364_s17, %s1358_s25 }
 0x7b5   : > { %p1361_p3 = pneg %p1360_p2 }
 0x7b6   : > { %p1367_p8 = por %p1366_p7, %p1365_p4 }
 0x7b8   : > { %p1368_p9 = pnand %p1367_p8, %p1361_p3 }
 0x7ba   : > { %1371 = shalt.err (!%p1368_p9)
}
 0x7bb   : > { %s1372_s23 = scalar_lea.hbm %s1809_s19, 256  ;;  %s1376_s20 = scalar_lea.hbm %s1891_s6, 512 }
 0x7bc   : > { %p1373_p10 = scmp.ne.s32.totalorder %s1809_s19, %s1372_s23  ;;  %p1377_p13 = scmp.lt.u32.totalorder %s1809_s19, %s1891_s6 }
 0x7bd   : > { %p1378_p0 = scmp.lt.u32.totalorder %s1376_s20, %s1372_s23  ;;  %p1380_p2 = scmp.lt.u32.totalorder %s1372_s23, %s1809_s19 }
 0x7be   : > { %p1374_p11 = pnand %p1373_p10, %p1524_p5 }
 0x7bf   : > { %p1379_p1 = por %p1378_p0, %p1377_p13 }
 0x7c0   : > { %p1375_p12 = pneg %p1374_p11 }
 0x7c1   : > { %p1381_p3 = por %p1380_p2, %p1379_p1 }
 0x7c3   : > { %p1382_p4 = pnand %p1381_p3, %p1375_p12 }
 0x7c5   : > { %1385 = shalt.err (!%p1382_p4)
}
 0x7c6   : > { %1239 = dma.vmem_to_hbm [thread:$0]  (%p1524_p5), %s1804_s10, 256, %s1809_s19, %s1051_s5, %s1440_s15, %s1440_s15, %s1441_s24  }
 0x7c7 PF: > { %p1250_p7 = scmp.ge.s32.totalorder %s1424_s29, 2  ;;  %s1100_s25 = sand.u32 1, %s1412_s26  }
 0x7c8   : > { %s1101_s30 = scalar_lea.sflag [#allocation5], %s1100_s25 }
 0x7c9   : > { %p1244_p8 = pnand %p1250_p7, %p1528_p6 }
 0x7cb   : > { %1403 = dma.done.wait (!%p1244_p8), %s1101_s30, 256  }
 0x7cc   : > { %1405 = vsyncadd (!%p1244_p8), %s1101_s30, 4294967040  ;;  %s1110_s12 = scalar_lea.sflag [#allocation7], %s1100_s25 }
 0x7cd   : > { %1407 = dma.done.wait (!%p1244_p8), %s1110_s12, 256  }
 0x7ce   : > { %1409 = vsyncadd (!%p1244_p8), %s1110_s12, 4294967040  ;;  %p22_p5 = scmp.ge.s32.totalorder %s1511_s8, 4   ;;  %s1895_s26 = smov %s1416_s27 }
 0x7cf   : > { %s1896_s27 = smov %s1420_s28  ;;  %s1897_s28 = smov %s1522_s11 }
 0x7d0   : > { %s1898_s29 = smov %s1511_s8  ;;  %24 = sbr.rel (!%p22_p5) target bundleno = 7 (0x7), region = 96 }
 0x7d7   :  { %1115 = vsyncpa [#allocation5], 1 }
 0x7d8   :  { %1117 = vsyncpa [#allocation5 + $0x1], 1 }
 0x7d9   :  { %1118 = vsyncpa [#allocation7], 1 }
 0x7da   :  { %1120 = vsyncpa [#allocation7 + $0x1], 1 }

</bundles_post_ra>
